<compile_context>
chip_gen: v5e
topology: v5e:2x2
jax: 0.10.0
libtpu: 0.0.40
codegen_flags: <defaults>
</compile_context>

<pallas_src>
import functools

import jax
import jax.numpy as jnp
from jax.experimental import pallas as pl
from jax.experimental.pallas import tpu as pltpu

TEMPERATURE = 0.07
EPS = 1e-12          # torch.nn.functional.normalize default eps
_NEG_BIG = -1e30     # acts as -inf but keeps exp/log finite


def _supcon_kernel(feat_ref, lab_col_ref, lab_row_ref, out_ref, *, inv_temp):
    """One batch tile: writes per-sample -mean_log_prob_pos into out_ref [TB, 1]."""
    feats = feat_ref[...]                                       # [TB, V, D], native dtype
    tb, v, _ = feats.shape

    # anchor . view_v on the VPU: broadcast-multiply + lane reduce, f32 accumulate.
    anchor = feats[:, 0:1, :]                                   # [TB, 1, D]
    raw = jnp.sum(anchor * feats, axis=-1, dtype=jnp.float32)   # [TB, V]
    c_nrm2 = jnp.sum(feats * feats, axis=-1, dtype=jnp.float32)  # [TB, V]
    a_nrm2 = raw[:, 0:1]                                        # anchor.anchor == column 0

    # Fold L2 norms and 1/temperature into the [TB, V] result (rsqrt -> EUP).
    # x / max(||x||, eps) == x * rsqrt(max(||x||^2, eps^2)): matches F.normalize.
    inv_a = jax.lax.rsqrt(jnp.maximum(a_nrm2, EPS * EPS))
    inv_c = jax.lax.rsqrt(jnp.maximum(c_nrm2, EPS * EPS))
    adc = raw * (inv_a * inv_temp) * inv_c                      # [TB, V]

    # Exclude view/column 0 (torch slices it away) without misaligned slices.
    col0 = jax.lax.broadcasted_iota(jnp.int32, (tb, v), 1) == 0
    adc = jnp.where(col0, _NEG_BIG, adc)

    # Supervised positive mask with column 0 zeroed (== torch's mask[:, 1:]).
    mask = jnp.where(col0, 0.0,
                     (lab_col_ref[...] == lab_row_ref[...]).astype(jnp.float32))

    # mean_log_prob_pos without materializing log_prob:
    #   sum(mask * log_prob)/cnt == sum(mask*adc)/cnt - row_max - log(sum_exp)
    row_max = jnp.max(adc, axis=-1, keepdims=True)              # [TB, 1]
    sum_exp = jnp.sum(jnp.exp(adc - row_max), axis=-1, keepdims=True)
    pos_cnt = jnp.sum(mask, axis=-1, keepdims=True)             # 0 -> NaN, as in torch
    mean_lpp = (jnp.sum(mask * adc, axis=-1, keepdims=True) / pos_cnt
                - row_max - jnp.log(sum_exp))
    out_ref[...] = -mean_lpp                                    # [TB, 1]


def _round_up(x, m):
    return (x + m - 1) // m * m


def _vmem_budget_bytes():
    """Per-generation scoped-VMEM budget (v5e/v6e 128 MiB, v7x 64 MiB physical)."""
    try:
        cap = int(pltpu.get_tpu_info().vmem_capacity_bytes)
    except Exception:
        cap = 64 * 1024 * 1024        # conservative: v7x per-TensorCore VMEM
    budget = min((cap * 3) // 4, 100 * 1024 * 1024)   # headroom for Mosaic scratch
    return max(budget, 32 * 1024 * 1024)


def _pick_block_b(B, V, D, feat_bytes, budget):
    """Largest batch tile (rows) whose VMEM footprint fits `budget`."""
    sub = 16 if feat_bytes < 4 else 8                  # sublane packing of feature tile
    rV, rD, rB = _round_up(V, sub), _round_up(D, 128), _round_up(B, 128)
    # per-row bytes: double-buffered feature tile (lane-padded) + one full-width
    # f32 elementwise/reduce temporary + a handful of [1, B]-wide f32 rows.
    per_row = 2 * rV * rD * feat_bytes + rV * rD * 4 + 8 * rB * 4
    fixed = 4 * 8 * rB * 4 + (1 << 20)                 # label-row buffers + slack
    cap_rows = max((budget - fixed) // per_row, 1)
    if cap_rows >= B:
        # Whole batch fits; still split into two even tiles when possible so a
        # v7x megacore can put one tile on each TensorCore.
        if B >= 16 and B % 16 == 0:
            return B // 2
        return B
    # Largest multiple-of-8 divisor of B that fits; prefer an even tile count.
    cands = [tb for tb in range(8, int(min(cap_rows, B)) + 1, 8) if B % tb == 0]
    if not cands:
        return B    # fallback: single tile (correctness over VMEM perf)
    even = [tb for tb in cands if (B // tb) % 2 == 0]
    return max(even) if even else max(cands)


def supcon_loss(features, labels, *, temperature=TEMPERATURE, block_b=None,
                feature_dtype=None, vmem_budget_bytes=None):
    """features: [B, V, D] float (V must equal B); labels: [B] int. Returns scalar."""
    B, V, D = features.shape
    assert V == B, "SupConLoss module semantics require num_views == batch_size"

    if feature_dtype is not None:
        # Optional bf16 ingest: halves HBM traffic; kernel accumulates in f32.
        features = features.astype(feature_dtype)
    feat_bytes = jnp.dtype(features.dtype).itemsize

    if vmem_budget_bytes is None:
        vmem_budget_bytes = _vmem_budget_bytes()
    if block_b is None:
        block_b = _pick_block_b(B, V, D, feat_bytes, vmem_budget_bytes)
    assert B % block_b == 0, "block_b must divide the batch"
    assert block_b == B or block_b % 8 == 0, "batch tile must be sublane-aligned"

    lab_col = labels.reshape(B, 1).astype(jnp.int32)
    lab_row = labels.reshape(1, B).astype(jnp.int32)
    n_tiles = B // block_b

    kernel = functools.partial(_supcon_kernel, inv_temp=1.0 / temperature)

    per_sample = pl.pallas_call(
        kernel,
        out_shape=jax.ShapeDtypeStruct((B, 1), jnp.float32),
        grid=(n_tiles,),
        in_specs=[
            pl.BlockSpec((block_b, V, D), lambda i: (i, 0, 0)),  # feature tile
            pl.BlockSpec((block_b, 1), lambda i: (i, 0)),        # labels (column tile)
            pl.BlockSpec((1, B), lambda i: (0, 0)),              # labels (full row)
        ],
        out_specs=pl.BlockSpec((block_b, 1), lambda i: (i, 0)),
        compiler_params=pltpu.CompilerParams(
            dimension_semantics=("parallel",),   # independent tiles -> megacore ok
            vmem_limit_bytes=int(vmem_budget_bytes),
        ),
    )(features, lab_col, lab_row)

    return jnp.mean(per_sample)  # == -mean_log_prob_pos.mean()


def supcon_loss_ref(features, labels, temperature=TEMPERATURE):
    """Pure-JAX mirror of the PyTorch forward (correctness reference)."""
    B = features.shape[0]
    lab = labels.reshape(-1, 1)
    mask = (lab == lab.T).astype(jnp.float32)
    cf = features.reshape(B, -1, features.shape[-1])
    anchor = cf[:, 0]
    contrast = cf[:, 1:]
    anchor = anchor / jnp.maximum(
        jnp.linalg.norm(anchor, axis=1, keepdims=True), EPS)
    contrast = contrast / jnp.maximum(
        jnp.linalg.norm(contrast, axis=-1, keepdims=True), EPS)
    adc = jnp.einsum("bd,bvd->bv", anchor, contrast) / temperature
    logits = adc - jnp.max(adc, axis=1, keepdims=True)
    log_prob = logits - jnp.log(jnp.exp(logits).sum(1, keepdims=True))
    mask = mask[:, 1:]
    mlpp = (mask * log_prob).sum(1) / mask.sum(1)
    return -mlpp.mean()


if __name__ == "__main__":
    B, D = 16, 32  # V == B is required by the module's broadcasting
    key = jax.random.PRNGKey(0)
    features = jax.random.normal(key, (B, B, D), dtype=jnp.float32)
    # Every label repeats, so each row has positives among columns 1..B-1 (no NaN).
    labels = jnp.arange(B, dtype=jnp.int32) % 4

    ref = supcon_loss_ref(features, labels)

    # f32 path (block_b auto-sized from the VMEM budget -> 8 rows, 2 tiles here).
    loss = supcon_loss(features, labels)
    jax.block_until_ready(loss)
    assert jnp.isfinite(loss), "loss is not finite"
    assert jnp.allclose(loss, ref, rtol=1e-4, atol=1e-4), (loss, ref)

    # bf16-ingest path (half the HBM bytes; f32 accumulation inside the kernel).
    loss_bf16 = supcon_loss(features, labels, feature_dtype=jnp.bfloat16)
    jax.block_until_ready(loss_bf16)
    assert jnp.isfinite(loss_bf16), "bf16 loss is not finite"
    assert abs(float(loss_bf16) - float(ref)) <= 0.15 * abs(float(ref)) + 0.05, (
        loss_bf16, ref)

    print("KERNEL_OK")
</pallas_src>

<mosaic_0001>
module attributes {stable_mosaic.version = 11 : i64} {
  func.func @_supcon_kernel(%arg0: i32, %arg1: memref<8x16x32xf32, #tpu.memory_space<vmem>>, %arg2: memref<8x1xi32, #tpu.memory_space<vmem>>, %arg3: memref<1x16xi32, #tpu.memory_space<vmem>>, %arg4: memref<8x1xf32, #tpu.memory_space<vmem>>) attributes {dimension_semantics = [#tpu.dimension_semantics<parallel>], iteration_bounds = array<i64: 2>, scalar_prefetch = 0 : i64, scratch_operands = 0 : i64, tpu.core_type = #tpu.core_type<tc>, window_params = [{transform_indices = @transform_0, window_bounds = array<i64: 8, 16, 32>}, {transform_indices = @transform_1, window_bounds = array<i64: 8, 1>}, {pipeline_mode = #tpu.pipeline_mode<synchronous>, transform_indices = @transform_2, window_bounds = array<i64: 1, 16>}, {transform_indices = @transform_3, window_bounds = array<i64: 8, 1>}]} {
    %c0 = arith.constant 0 : index
    %c0_0 = arith.constant 0 : index
    %c0_1 = arith.constant 0 : index
    %0 = vector.load %arg1[%c0, %c0_0, %c0_1] : memref<8x16x32xf32, #tpu.memory_space<vmem>>, vector<8x16x32xf32>
    %1 = vector.extract_strided_slice %0 {offsets = [0, 0, 0], sizes = [8, 1, 32], strides = [1, 1, 1]} : vector<8x16x32xf32> to vector<8x1x32xf32>
    %2 = vector.broadcast %1 : vector<8x1x32xf32> to vector<8x16x32xf32>
    %3 = arith.mulf %2, %0 : vector<8x16x32xf32>
    %cst = arith.constant dense<0.000000e+00> : vector<8x16xf32>
    %4 = vector.multi_reduction <add>, %3, %cst [2] : vector<8x16x32xf32> to vector<8x16xf32>
    %5 = arith.mulf %0, %0 : vector<8x16x32xf32>
    %cst_2 = arith.constant dense<0.000000e+00> : vector<8x16xf32>
    %6 = vector.multi_reduction <add>, %5, %cst_2 [2] : vector<8x16x32xf32> to vector<8x16xf32>
    %7 = vector.extract_strided_slice %4 {offsets = [0, 0], sizes = [8, 1], strides = [1, 1]} : vector<8x16xf32> to vector<8x1xf32>
    %cst_3 = arith.constant 1.000000e-24 : f32
    %8 = vector.broadcast %cst_3 : f32 to vector<8x1xf32>
    %9 = arith.maximumf %7, %8 : vector<8x1xf32>
    %10 = math.rsqrt %9 : vector<8x1xf32>
    %cst_4 = arith.constant 1.000000e-24 : f32
    %11 = vector.broadcast %cst_4 : f32 to vector<8x16xf32>
    %12 = arith.maximumf %6, %11 : vector<8x16xf32>
    %13 = math.rsqrt %12 : vector<8x16xf32>
    %cst_5 = arith.constant 14.2857141 : f32
    %14 = vector.broadcast %cst_5 : f32 to vector<8x1xf32>
    %15 = arith.mulf %10, %14 : vector<8x1xf32>
    %16 = vector.broadcast %15 : vector<8x1xf32> to vector<8x16xf32>
    %17 = arith.mulf %4, %16 : vector<8x16xf32>
    %18 = arith.mulf %17, %13 : vector<8x16xf32>
    %19 = tpu.iota {dimensions = array<i32: 1>} : vector<8x16xi32>
    %c0_i32 = arith.constant 0 : i32
    %20 = vector.broadcast %c0_i32 : i32 to vector<8x16xi32>
    %21 = arith.cmpi eq, %19, %20 : vector<8x16xi32>
    %cst_6 = arith.constant -1.000000e+30 : f32
    %22 = vector.broadcast %cst_6 : f32 to vector<8x16xf32>
    %23 = arith.select %21, %22, %18 : vector<8x16xi1>, vector<8x16xf32>
    %c0_7 = arith.constant 0 : index
    %c0_8 = arith.constant 0 : index
    %24 = vector.load %arg2[%c0_7, %c0_8] : memref<8x1xi32, #tpu.memory_space<vmem>>, vector<8x1xi32>
    %c0_9 = arith.constant 0 : index
    %c0_10 = arith.constant 0 : index
    %25 = vector.load %arg3[%c0_9, %c0_10] : memref<1x16xi32, #tpu.memory_space<vmem>>, vector<1x16xi32>
    %26 = vector.broadcast %24 : vector<8x1xi32> to vector<8x16xi32>
    %27 = vector.broadcast %25 : vector<1x16xi32> to vector<8x16xi32>
    %28 = arith.cmpi eq, %26, %27 : vector<8x16xi32>
    %29 = arith.extui %28 : vector<8x16xi1> to vector<8x16xi32>
    %30 = arith.sitofp %29 : vector<8x16xi32> to vector<8x16xf32>
    %cst_11 = arith.constant 0.000000e+00 : f32
    %31 = vector.broadcast %cst_11 : f32 to vector<8x16xf32>
    %32 = arith.select %21, %31, %30 : vector<8x16xi1>, vector<8x16xf32>
    %cst_12 = arith.constant dense<0xFF800000> : vector<8xf32>
    %33 = vector.multi_reduction <maximumf>, %23, %cst_12 [1] : vector<8x16xf32> to vector<8xf32>
    %34 = vector.shape_cast %33 : vector<8xf32> to vector<8x1xf32>
    %35 = vector.broadcast %34 : vector<8x1xf32> to vector<8x16xf32>
    %36 = arith.subf %23, %35 : vector<8x16xf32>
    %37 = math.exp %36 : vector<8x16xf32>
    %cst_13 = arith.constant dense<0.000000e+00> : vector<8xf32>
    %38 = vector.multi_reduction <add>, %37, %cst_13 [1] : vector<8x16xf32> to vector<8xf32>
    %39 = vector.shape_cast %38 : vector<8xf32> to vector<8x1xf32>
    %cst_14 = arith.constant dense<0.000000e+00> : vector<8xf32>
    %40 = vector.multi_reduction <add>, %32, %cst_14 [1] : vector<8x16xf32> to vector<8xf32>
    %41 = vector.shape_cast %40 : vector<8xf32> to vector<8x1xf32>
    %42 = arith.mulf %32, %23 : vector<8x16xf32>
    %cst_15 = arith.constant dense<0.000000e+00> : vector<8xf32>
    %43 = vector.multi_reduction <add>, %42, %cst_15 [1] : vector<8x16xf32> to vector<8xf32>
    %44 = vector.shape_cast %43 : vector<8xf32> to vector<8x1xf32>
    %45 = arith.divf %44, %41 : vector<8x1xf32>
    %46 = arith.subf %45, %34 : vector<8x1xf32>
    %47 = math.log %39 : vector<8x1xf32>
    %48 = arith.subf %46, %47 : vector<8x1xf32>
    %cst_16 = arith.constant 0.000000e+00 : f32
    %49 = vector.broadcast %cst_16 : f32 to vector<8x1xf32>
    %50 = arith.subf %49, %48 : vector<8x1xf32>
    %c0_17 = arith.constant 0 : index
    %c0_18 = arith.constant 0 : index
    %51 = vector.load %arg4[%c0_17, %c0_18] : memref<8x1xf32, #tpu.memory_space<vmem>>, vector<8x1xf32>
    tpu.vector_store %arg4[%c0_17, %c0_18], %50 {strides = array<i32>} : memref<8x1xf32, #tpu.memory_space<vmem>>, vector<8x1xf32>,
    return
  }
  func.func @transform_0(%arg0: i32) -> (i32, i32, i32) {
    %c0_i32 = arith.constant 0 : i32
    %c0_i32_0 = arith.constant 0 : i32
    %c0_i32_1 = arith.constant 0 : i32
    return %arg0, %c0_i32, %c0_i32_0 : i32, i32, i32
  }
  func.func @transform_1(%arg0: i32) -> (i32, i32) {
    %c0_i32 = arith.constant 0 : i32
    %c0_i32_0 = arith.constant 0 : i32
    return %arg0, %c0_i32 : i32, i32
  }
  func.func @transform_2(%arg0: i32) -> (i32, i32) {
    %c0_i32 = arith.constant 0 : i32
    %c0_i32_0 = arith.constant 0 : i32
    %c0_i32_1 = arith.constant 0 : i32
    return %c0_i32, %c0_i32_0 : i32, i32
  }
  func.func @transform_3(%arg0: i32) -> (i32, i32) {
    %c0_i32 = arith.constant 0 : i32
    %c0_i32_0 = arith.constant 0 : i32
    return %arg0, %c0_i32 : i32, i32
  }
}

</mosaic_0001>

<bundles_post_ra>
// kernel: tpu_custom_call.1
= control target key start
LH: loop header
LB: loop body
LE: loop exit
PB: predicated region body
PF: predicated region fallthrough
CT: control target
= control target key end

     0   :  { %8 = vsyncpa [#allocation3], 0  ;;  %s1908_s0 = inlined_call_operand.hbm [shape: f32[16,16,32], index: 0, kind: input, shape index: {}]   ;;  %s1909_s1 = inlined_call_operand.vmem [shape: s32[16,1], index: 1, kind: input, shape index: {}]   ;;  %s1910_s2 = inlined_call_operand.vmem [shape: s32[1,16], index: 2, kind: input, shape index: {}]   ;;  %s1911_s3 = inlined_call_operand.vmem [shape: f32[16,1], index: 3, kind: output, shape index: {}]  }
   0x1   :  { %10 = vsyncpa [#allocation3 + $0x1], 0  ;;  %s1068_s12 = smov 0   ;;  %s1070_s13 = smov 0  }
   0x2   :  { %s1072_s14 = smov 0   ;;  %s1074_s15 = smov 0  }
   0x3 LB: > { %s1087_s16 = sadd.s32 4294967295, %s1042_s15   ;;  %s1090_s17 = sadd.s32 1, %s1042_s15   ;;  %s1042_s15 = sphi %s1074_s15, %s1957_s15   ;;  %s1038_s14 = sphi %s1072_s14, %s1956_s14   ;;  %s1034_s13 = sphi %s1070_s13, %s1955_s13   ;;  %s1030_s12 = sphi %s1068_s12, %s1954_s12  }
   0x4   : > { %s20_s18 = ssub.s32 %s1042_s15, %s1090_s17  ;;  %s23_s19 = sadd.s32 1, %s1038_s14 }
   0x5   : > { %p21_p0 = scmp.eq.s32.totalorder %s20_s18, 0  ;;  %p30_p1 = scmp.ne.s32.totalorder %s1038_s14, %s1034_s13 }
   0x6   : > { %p31_p2 = scmp.eq.s32.totalorder %s1042_s15, 0  ;;  %p36_p3 = scmp.ne.s32.totalorder %s1034_s13, %s1030_s12 }
   0x7   : > { %s1100_s20 = scalar_select %p21_p0, %s1038_s14, %s23_s19  }
   0x8   : > { %p1102_p4 = por %p31_p2, %p30_p1  ;;  %p37_p5 = scmp.eq.s32.totalorder %s1087_s16, 0 }
   0x9   : > { %p884_p6 = scmp.lt.s32.totalorder %s1042_s15, 2  ;;  %s136_s23 = sand.u32 1, %s1038_s14  }
   0xa   : > { %p1108_p7 = por %p37_p5, %p36_p3  ;;  %s865_s24 = sshll.u32 %s136_s23, 7 }
   0xb   : > { %s877_s25 = sshll.u32 %s1042_s15, 7  ;;  %s140_s29 = scalar_lea.vmem [#allocation2], %s865_s24 }
   0xc   : > { %s146_s28 = scalar_lea.hbm %s1908_s0, %s877_s25  ;;  %s149_s30 = sshll.u32 %s140_s29, 4  ;;  %s150_s30 = int_to_ptr.vmem [resolvable:$true] %s149_s30 }
   0xd   : > { %s147_s4 = sshll.u32 %s146_s28, 4  ;;  %p1119_p8 = pnand %p884_p6, %p1102_p4  ;;  %s148_s4 = int_to_ptr.hbm [resolvable:$true] %s147_s4 }
   0xe   : > { %p869_p9 = scmp.ge.s32.totalorder %s1042_s15, 1  ;;  %s137_s6 = scalar_lea.sflag [#allocation3], %s136_s23 }
   0xf   : > { %s978_s7 = sshra.s32 %s148_s4, 4  ;;  %p982_p11 = pneg %p1119_p8  ;;  %s979_s7 = int_to_ptr.hbm [resolvable:$true] %s978_s7 }
  0x10   : > { %s980_s8 = scalar_lea.hbm %s979_s7, 128  ;;  %s985_s11 = scalar_lea.hbm %s1908_s0, 256 }
  0x11   : > { %p981_p10 = scmp.ne.s32.totalorder %s979_s7, %s980_s8  ;;  %p986_p0 = scmp.lt.s32.totalorder %s979_s7, %s1908_s0 }
  0x12   : > { %p987_p1 = scmp.lt.s32.totalorder %s985_s11, %s980_s8 }
  0x13   : > { %p983_p12 = pnand %p982_p11, %p981_p10 }
  0x14   : > { %p988_p2 = por %p987_p1, %p986_p0 }
  0x15   : > { %p984_p13 = pneg %p983_p12 }
  0x17   : > { %p989_p3 = pnand %p988_p2, %p984_p13 }
  0x19   : > { %992 = shalt.err (!%p989_p3)
}
  0x1a   : > { %s1044_s19 = smov 128   ;;  %s1045_s21 = smov 8  }
  0x1b   : > { %883 = dma.hbm_to_vmem [thread:$0]  (!%p1119_p8), %s148_s4, 2048, %s150_s30, %s137_s6, %s1044_s19, %s1044_s19, %s1045_s21  }
  0x1c   : > { %p164_p4 = scmp.lt.s32.totalorder %s1042_s15, 3 }
  0x1e   : > { %p165_p5 = pnand %p869_p9, %p164_p4 }
  0x1f   : > { %s170_s23 = sand.u32 (!%p165_p5), 1, %s1034_s13  }
  0x20   : > { %168 = sbr.rel (%p165_p5) target bundleno = 518 (0x206), region = 32  ;;  %s870_s24 = sshll.u32 (!%p165_p5), %s170_s23, 7 }
  0x21   : > { %s171_s25 = scalar_lea.sflag (!%p165_p5), [#allocation3], %s170_s23  ;;  %s1138_s26 = scalar_lea.vmem (!%p165_p5), [#allocation2], %s870_s24 }
  0x25   : > { %1025 = dma.done.wait (%p1108_p7), %s171_s25, 2048  }
  0x26   : > { %1027 = vsyncadd (%p1108_p7), %s171_s25, 4294965248  ;;  %v1145_v0 = vld [vmem:[%s1138_s26 + $0x40] sm:$0xff]  ;;  %v1157_v6 = vld [vmem:[%s1138_s26 + $0x50] sm:$0xff]  ;;  %vm250_vm0 = vcmask 261120   ;;  %p202_p6 = scmp.lt.s32.totalorder %s1087_s16, 1 }
  0x27   : > { %v1148_v1 = vld [vmem:[%s1138_s26 + $0x20] sm:$0xff]  ;;  %v230_v3 = vperm.slane %v1145_v0, 0  ;;  %v1160_v7 = vld [vmem:[%s1138_s26 + $0x30] sm:$0xff]  ;;  %v231_v9 = vperm.slane %v1157_v6, 0  ;;  %v1206_v34 = vld [vmem:[%s1138_s26 + $0x18] sm:$0xff]  ;;  %v307_v55 = vmul.f32 %v1145_v0, %v1145_v0 }
  0x28   : > { %v1151_v2 = vld [vmem:[%s1138_s26] sm:$0xff]  ;;  %v228_v4 = vperm.slane %v1148_v1, 0  ;;  %v1163_v8 = vld [vmem:[%s1138_s26 + $0x10] sm:$0xff]  ;;  %v229_v13 = vperm.slane %v1160_v7, 0  ;;  %v211_v35 = vld [vmem:[%s1138_s26 + $0x8] sm:$0xff]  ;;  %v302_v37 = vmul.f32 %v1206_v34, %v1206_v34  ;;  %v305_v44 = vmul.f32 %v1160_v7, %v1160_v7  ;;  %s1959_s16 = smov (!%p202_p6, %s1087_s16), 1 }
  0x29   : > { %v226_v5 = vperm.slane %v1151_v2, 0  ;;  %v242_v10 = vmul.f32 %v230_v3, %v1145_v0  ;;  %v227_v14 = vperm.slane %v1163_v8, 0  ;;  %v244_v18 = vmul.f32 %v231_v9, %v1157_v6  ;;  %v1186_v21 = vld [vmem:[%s1138_s26 + $0x70] sm:$0xff]  ;;  %v1189_v22 = vld [vmem:[%s1138_s26 + $0x60] sm:$0xff]  ;;  %v215_v42 = vld [vmem:[%s1138_s26 + $0x28] sm:$0xff]  ;;  %s871_s15 = sshll.u32 %s1959_s16, 3 }
  0x2a   : > { %v238_v11 = vmul.f32 %v228_v4, %v1148_v1  ;;  %v240_v19 = vmul.f32 %v229_v13, %v1160_v7  ;;  %v233_v25 = vperm.slane %v1186_v21, 0  ;;  %v232_v27 = vperm.slane %v1189_v22, 0  ;;  %v219_v49 = vld [vmem:[%s1138_s26 + $0x48] sm:$0xff]  ;;  %v217_v52 = vld [vmem:[%s1138_s26 + $0x38] sm:$0xff]  ;;  %s205_s28 = scalar_lea.vmem %s1909_s1, %s871_s15  ;;  %s209_s6 = scalar_lea.vmem %s1911_s3, %s871_s15 }
  0x2b   : > { %v234_v12 = vmul.f32 %v226_v5, %v1151_v2  ;;  %v275_v15 = vsel %vm250_vm0, %v242_v10, 0.0  ;;  %v236_v20 = vmul.f32 %v227_v14, %v1163_v8  ;;  %v281_v23 = vsel %vm250_vm0, %v244_v18, 0.0  ;;  %v221_v62 = vld [vmem:[%s1138_s26 + $0x58] sm:$0xff] }
  0x2c   : > { %v263_v16 = vsel %vm250_vm0, %v238_v11, 0.0  ;;  %276 = vadd.xlane.f32.xlu2 %v275_v15  ;;  %v269_v24 = vsel %vm250_vm0, %v240_v19, 0.0  ;;  %v248_v28 = vmul.f32 %v233_v25, %v1186_v21  ;;  %v299_v29 = vmul.f32 %v1151_v2, %v1151_v2  ;;  %v225_v0 = vld [vmem:[%s1138_s26 + $0x78] sm:$0xff]  ;;  %v223_v15 = vld [vmem:[%s1138_s26 + $0x68] sm:$0xff] }
  0x2d   : > { %v251_v17 = vsel %vm250_vm0, %v234_v12, 0.0  ;;  %264 = vadd.xlane.f32.xlu1 %v263_v16  ;;  %v257_v26 = vsel %vm250_vm0, %v236_v20, 0.0  ;;  %v246_v30 = vmul.f32 %v232_v27, %v1189_v22  ;;  %v301_v36 = vmul.f32 %v1163_v8, %v1163_v8  ;;  %v736_v8 = vld [vmem:[%s205_s28] sm:$0xff] }
  0x2e   : > { %252 = vadd.xlane.f32.xlu0 %v251_v17  ;;  %v293_v31 = vsel %vm250_vm0, %v248_v28, 0.0  ;;  %v315_v32 = vsel %vm250_vm0, %v299_v29, 0.0  ;;  %v300_v38 = vmul.f32 %v211_v35, %v211_v35  ;;  %v324_v40 = vsel %vm250_vm0, %v302_v37, 0.0 }
  0x2f   : > { %v287_v33 = vsel %vm250_vm0, %v246_v30, 0.0  ;;  %v321_v39 = vsel %vm250_vm0, %v301_v36, 0.0  ;;  %v304_v43 = vmul.f32 %v215_v42, %v215_v42  ;;  %v303_v45 = vmul.f32 %v1148_v1, %v1148_v1 }
  0x30   : > { %v318_v41 = vsel %vm250_vm0, %v300_v38, 0.0  ;;  %v333_v47 = vsel %vm250_vm0, %v305_v44, 0.0  ;;  %v239_v50 = vmul.f32 %v228_v4, %v215_v42  ;;  %v235_v51 = vmul.f32 %v226_v5, %v211_v35 }
  0x31   : > { %v330_v46 = vsel %vm250_vm0, %v304_v43, 0.0  ;;  %v327_v48 = vsel %vm250_vm0, %v303_v45, 0.0  ;;  %v308_v56 = vmul.f32 %v219_v49, %v219_v49  ;;  %v243_v57 = vmul.f32 %v230_v3, %v219_v49 }
  0x32   : > { %v266_v53 = vsel %vm250_vm0, %v239_v50, 0.0  ;;  %v254_v54 = vsel %vm250_vm0, %v235_v51, 0.0  ;;  %v306_v58 = vmul.f32 %v217_v52, %v217_v52  ;;  %v339_v60 = vsel %vm250_vm0, %v307_v55, 0.0 }
  0x33   : > { %v278_v59 = vsel %vm250_vm0, %v243_v57, 0.0  ;;  %v342_v61 = vsel %vm250_vm0, %v308_v56, 0.0  ;;  %v245_v1 = vmul.f32 %v231_v9, %v221_v62  ;;  %v241_v2 = vmul.f32 %v229_v13, %v217_v52 }
  0x34   : > { %282 = vadd.xlane.f32.xlu2 %v281_v23  ;;  %v336_v63 = vsel %vm250_vm0, %v306_v58, 0.0  ;;  %v310_v5 = vmul.f32 %v221_v62, %v221_v62  ;;  %v311_v10 = vmul.f32 %v1189_v22, %v1189_v22  ;;  %v249_v11 = vmul.f32 %v233_v25, %v225_v0 }
  0x35   : > { %270 = vadd.xlane.f32.xlu1 %v269_v24  ;;  %v284_v3 = vsel %vm250_vm0, %v245_v1, 0.0  ;;  %v272_v4 = vsel %vm250_vm0, %v241_v2, 0.0  ;;  %v309_v12 = vmul.f32 %v1157_v6, %v1157_v6  ;;  %v247_v17 = vmul.f32 %v232_v27, %v223_v15 }
  0x36   : > { %258 = vadd.xlane.f32.xlu0 %v257_v26  ;;  %v296_v9 = vsel %vm250_vm0, %v249_v11, 0.0  ;;  %v348_v7 = vsel %vm250_vm0, %v310_v5, 0.0  ;;  %v351_v13 = vsel %vm250_vm0, %v311_v10, 0.0  ;;  %v313_v6 = vmul.f32 %v1186_v21, %v1186_v21 }
  0x37   : > { %v345_v16 = vsel %vm250_vm0, %v309_v12, 0.0  ;;  %v290_v18 = vsel %vm250_vm0, %v247_v17, 0.0  ;;  %v314_v19 = vmul.f32 %v225_v0, %v225_v0  ;;  %v312_v20 = vmul.f32 %v223_v15, %v223_v15 }
  0x38   : > { %v1046_v23 = vmov 0   ;;  %v357_v24 = vsel %vm250_vm0, %v313_v6, 0.0  ;;  %v237_v21 = vmul.f32 %v227_v14, %v1206_v34  ;;  %v675_v11 = vlaneseq }
  0x39   : > { %921 = vset.pattern.permute.xlu2 %v1046_v23  ;;  %922 = vset.pattern.permute.xlu0 %v1046_v23  ;;  %v360_v25 = vsel %vm250_vm0, %v314_v19, 0.0  ;;  %v354_v22 = vsel %vm250_vm0, %v312_v20, 0.0 }
  0x3a   : > { %v260_v26 = vsel %vm250_vm0, %v237_v21, 0.0 }
  0x3c   : > { %316 = vadd.xlane.f32.xlu2 %v315_v32 }
  0x3d   : > { %294 = vadd.xlane.f32.xlu1 %v293_v31 }
  0x3e   : > { %288 = vadd.xlane.f32.xlu0 %v287_v33 }
  0x44   : > { %325 = vadd.xlane.f32.xlu2 %v324_v40 }
  0x45   : > { %322 = vadd.xlane.f32.xlu1 %v321_v39 }
  0x46   : > { %319 = vadd.xlane.f32.xlu0 %v318_v41 }
  0x4c   : > { %334 = vadd.xlane.f32.xlu2 %v333_v47 }
  0x4d   : > { %331 = vadd.xlane.f32.xlu1 %v330_v46 }
  0x4e   : > { %328 = vadd.xlane.f32.xlu0 %v327_v48 }
  0x54   : > { %343 = vadd.xlane.f32.xlu2 %v342_v61 }
  0x55   : > { %340 = vadd.xlane.f32.xlu1 %v339_v60 }
  0x56   : > { %337 = vadd.xlane.f32.xlu0 %v336_v63 }
  0x5c   : > { %352 = vadd.xlane.f32.xlu2 %v351_v13 }
  0x5d   : > { %349 = vadd.xlane.f32.xlu1 %v348_v7 }
  0x5e   : > { %346 = vadd.xlane.f32.xlu0 %v345_v16 }
  0x64   : > { %361 = vadd.xlane.f32.xlu2 %v360_v25 }
  0x65   : > { %358 = vadd.xlane.f32.xlu1 %v357_v24 }
  0x66   : > { %355 = vadd.xlane.f32.xlu0 %v354_v22  ;;  %v1370_v22 = vand.u32 127, %v675_v11 }
  0x6c   : > { %267 = vadd.xlane.f32.xlu2 %v266_v53 }
  0x6d   : > { %261 = vadd.xlane.f32.xlu1 %v260_v26 }
  0x6e   : > { %255 = vadd.xlane.f32.xlu0 %v254_v54 }
  0x74   : > { %285 = vadd.xlane.f32.xlu2 %v284_v3 }
  0x75   : > { %279 = vadd.xlane.f32.xlu1 %v278_v59 }
  0x76   : > { %273 = vadd.xlane.f32.xlu0 %v272_v4 }
  0x7d   : > { %297 = vadd.xlane.f32.xlu1 %v296_v9 }
  0x7e   : > { %291 = vadd.xlane.f32.xlu0 %v290_v18 }
  0x8c   : > { %739 = vperm.xlu2 %921, %v736_v8  }
  0x9f   : > { %v1275_v14 = vpop.xlane.xlu2 %276 }
  0xa0   : > { %v1277_v27 = vpop.xlane.xlu1 %264  ;;  %v367_v28 = vmax.f32 %v1275_v14, 1e-24 }
  0xa1   : > { %v365_v29 = vmax.f32 %v1277_v27, 1e-24  ;;  %v1281_v30 = vpop.xlane.xlu0 %252 }
  0xa2   : > { %v363_v31 = vmax.f32 %v1281_v30, 1e-24  ;;  %924 = vrsqrt.f32 %v367_v28  ;;  %vm417_vm1 = vweird.f32 %v367_v28 }
  0xa3   : > { %926 = vrsqrt.f32 %v365_v29  ;;  %vm397_vm6 = vweird.f32 %v365_v29 }
  0xa4   : > { %928 = vrsqrt.f32 %v363_v31  ;;  %vm377_vm8 = vweird.f32 %v363_v31 }
  0xa7   : > { %v1284_v32 = vpop.xlane.xlu2 %282 }
  0xa8   : > { %v1286_v33 = vpop.xlane.xlu1 %270  ;;  %v925_v34 = vpop.eup %924  ;;  %v1289_v35 = vmax.f32 %v1284_v32, 1e-24 }
  0xa9   : > { %v1292_v36 = vmax.f32 %v1286_v33, 1e-24  ;;  %v1294_v37 = vpop.xlane.xlu0 %258  ;;  %v1296_v38 = vpop.eup %926  ;;  %v412_v39 = vmul.f32 %v925_v34, %v367_v28  ;;  %vm418_vm2 = vweird.f32 %v925_v34 }
  0xaa   : > { %v1299_v40 = vmax.f32 %v1294_v37, 1e-24  ;;  %v1301_v41 = vpop.eup %928  ;;  %v392_v42 = vmul.f32 %v1296_v38, %v365_v29  ;;  %930 = vrsqrt.f32 %v1289_v35  ;;  %vm398_vm3 = vweird.f32 %v1296_v38  ;;  %vm1329_vm5 = vmor %vm417_vm1, %vm418_vm2 }
  0xab   : > { %v413_v43 = vmul.f32 %v925_v34, %v412_v39  ;;  %v372_v44 = vmul.f32 %v1301_v41, %v363_v31  ;;  %932 = vrsqrt.f32 %v1292_v36  ;;  %vm378_vm4 = vweird.f32 %v1301_v41  ;;  %vm1348_vm7 = vmor %vm397_vm6, %vm398_vm3 }
  0xac   : > { %v393_v45 = vmul.f32 %v1296_v38, %v392_v42  ;;  %934 = vrsqrt.f32 %v1299_v40  ;;  %vm1357_vm9 = vmor %vm377_vm8, %vm378_vm4  ;;  %vm427_vm10 = vweird.f32 %v1289_v35  ;;  %vm407_vm11 = vweird.f32 %v1292_v36 }
  0xad   : > { %v414_v46 = vmul.f32 0.5, %v413_v43  ;;  %v373_v47 = vmul.f32 %v1301_v41, %v372_v44  ;;  %vm387_vm12 = vweird.f32 %v1299_v40 }
  0xae   : > { %v394_v48 = vmul.f32 0.5, %v393_v45 }
  0xaf   : > { %v415_v49 = vsub.f32 1.5, %v414_v46  ;;  %v374_v50 = vmul.f32 0.5, %v373_v47  ;;  %v317_v52 = vpop.xlane.xlu2 %316 }
  0xb0   : > { %v1310_v51 = vpop.xlane.xlu1 %294  ;;  %v1312_v53 = vpop.eup %930  ;;  %v395_v54 = vsub.f32 1.5, %v394_v48  ;;  %v1337_v2 = vmax.f32 %v317_v52, 1e-24 }
  0xb1   : > { %v1316_v55 = vmax.f32 %v1310_v51, 1e-24  ;;  %v1318_v56 = vpop.xlane.xlu0 %288  ;;  %v1320_v57 = vpop.eup %932  ;;  %v416_v58 = vmul.f32 %v925_v34, %v415_v49  ;;  %v375_v59 = vsub.f32 1.5, %v374_v50  ;;  %v422_v60 = vmul.f32 %v1312_v53, %v1289_v35 }
  0xb2   : > { %v1325_v61 = vpop.eup %934  ;;  %v396_v63 = vmul.f32 %v1296_v38, %v395_v54  ;;  %v402_v1 = vmul.f32 %v1320_v57, %v1292_v36  ;;  %v1382_v31 = vmax.f32 %v1318_v56, 1e-24  ;;  %vm428_vm13 = vweird.f32 %v1312_v53 }
  0xb3   : > { %936 = vrsqrt.f32 %v1316_v55  ;;  %v420_v0 = vsel %vm1329_vm5, %v925_v34, %v416_v58  ;;  %v376_v3 = vmul.f32 %v1301_v41, %v375_v59  ;;  %v423_v4 = vmul.f32 %v1312_v53, %v422_v60  ;;  %vm1402_vm0 = vmor %vm427_vm10, %vm428_vm13 }
  0xb4   : > { %v382_v5 = vmul.f32 %v1325_v61, %v1299_v40  ;;  %v403_v10 = vmul.f32 %v1320_v57, %v402_v1  ;;  %v1353_v13 = vmul.f32 14.285714, %v420_v0  ;;  %v400_v17 = vsel %vm1348_vm7, %v1296_v38, %v396_v63 }
  0xb5   : > { %v424_v9 = vmul.f32 0.5, %v423_v4  ;;  %v380_v18 = vsel %vm1357_vm9, %v1301_v41, %v376_v3  ;;  %938 = vrsqrt.f32 %v1337_v2  ;;  %v1376_v28 = vmul.f32 14.285714, %v400_v17 }
  0xb6   : > { %v383_v7 = vmul.f32 %v1325_v61, %v382_v5  ;;  %v404_v16 = vmul.f32 0.5, %v403_v10  ;;  %v1378_v29 = vmul.f32 14.285714, %v380_v18  ;;  %v1916_v34 = vperm.slane %v1353_v13, 0 }
  0xb7   : > { %v326_v20 = vpop.xlane.xlu2 %325  ;;  %v425_v24 = vsub.f32 1.5, %v424_v9  ;;  %vm408_vm14 = vweird.f32 %v1320_v57  ;;  %940 = vrsqrt.f32 %v1382_v31  ;;  %vm388_vm15 = vweird.f32 %v1325_v61 }
  0xb8   : > { %v384_v6 = vmul.f32 0.5, %v383_v7  ;;  %v323_v19 = vpop.xlane.xlu1 %322  ;;  %v405_v25 = vsub.f32 1.5, %v404_v16  ;;  %v637_v46 = vperm.slane %v1376_v28, 0  ;;  %v1917_v47 = vperm.slane %v1378_v29, 0  ;;  %vm1416_vm2 = vmor %vm407_vm11, %vm408_vm14 }
  0xb9   : > { %v1368_v23 = vpop.eup %936  ;;  %v320_v21 = vpop.xlane.xlu0 %319  ;;  %v1387_v39 = vmax.f32 %v323_v19, 1e-24  ;;  %v426_v41 = vmul.f32 %v1312_v53, %v425_v24  ;;  %vm447_vm1 = vweird.f32 %v1316_v55  ;;  %v1412_v50 = vmul.f32 %v1916_v34, %v1275_v14  ;;  %vm1433_vm4 = vmor %vm387_vm12, %vm388_vm15 }
  0xba   : > { %v385_v26 = vsub.f32 1.5, %v384_v6  ;;  %v442_v8 = vmul.f32 %v1368_v23, %v1316_v55  ;;  %v406_v42 = vmul.f32 %v1320_v57, %v405_v25  ;;  %vm473_vm3 = vweird.f32 %v1337_v2 }
  0xbb   : > { %v1393_v43 = vpop.eup %938  ;;  %942 = vrsqrt.f32 %v1387_v39  ;;  %v1421_v54 = vmax.f32 %v326_v20, 1e-24  ;;  %v430_v60 = vsel %vm1402_vm0, %v1312_v53, %v426_v41  ;;  %v1438_v63 = vmax.f32 %v320_v21, 1e-24 }
  0xbc   : > { %v443_v38 = vmul.f32 %v1368_v23, %v442_v8  ;;  %v386_v44 = vmul.f32 %v1325_v61, %v385_v26  ;;  %v468_v49 = vmul.f32 %v1393_v43, %v1337_v2  ;;  %v410_v14 = vsel %vm1416_vm2, %v1320_v57, %v406_v42 }
  0xbd   : > { %vm448_vm5 = vweird.f32 %v1368_v23  ;;  %944 = vrsqrt.f32 %v1421_v54  ;;  %v1446_v40 = vpop.eup %940  ;;  %v1451_v57 = vmul.f32 %v637_v46, %v1277_v27  ;;  %v643_v3 = vmul.f32 %v1917_v47, %v1281_v30 }
  0xbe   : > { %v444_v45 = vmul.f32 0.5, %v443_v38  ;;  %v469_v62 = vmul.f32 %v1393_v43, %v468_v49  ;;  %v390_v53 = vsel %vm1433_vm4, %v1325_v61, %v386_v44  ;;  %946 = vrsqrt.f32 %v1438_v63  ;;  %vm1471_vm6 = vmor %vm447_vm1, %vm448_vm5 }
  0xbf   : > { %v335_v59 = vpop.xlane.xlu2 %334  ;;  %v1459_v5 = vmul.f32 14.285714, %v430_v60  ;;  %v1461_v10 = vmul.f32 14.285714, %v410_v14  ;;  %v432_v11 = vmul.f32 %v1446_v40, %v1382_v31  ;;  %v1467_v27 = vmul.f32 14.285714, %v390_v53 }
  0xc0   : > { %v445_v35 = vsub.f32 1.5, %v444_v45  ;;  %v332_v58 = vpop.xlane.xlu1 %331  ;;  %v470_v4 = vmul.f32 0.5, %v469_v62  ;;  %vm474_vm7 = vweird.f32 %v1393_v43  ;;  %v1483_v17 = vmax.f32 %v335_v59, 1e-24 }
  0xc1   : > { %v329_v1 = vpop.xlane.xlu0 %328  ;;  %v1457_v61 = vpop.eup %942  ;;  %v1465_v12 = vmax.f32 %v332_v58, 1e-24  ;;  %v433_v16 = vmul.f32 %v1446_v40, %v432_v11  ;;  %vm437_vm8 = vweird.f32 %v1382_v31  ;;  %v1915_v20 = vperm.slane %v1459_v5, 0  ;;  %vm1504_vm9 = vmor %vm473_vm3, %vm474_vm7 }
  0xc2   : > { %v446_v0 = vmul.f32 %v1368_v23, %v445_v35  ;;  %v471_v9 = vsub.f32 1.5, %v470_v4  ;;  %v488_v7 = vmul.f32 %v1457_v61, %v1387_v39  ;;  %v1488_v6 = vmax.f32 %v329_v1, 1e-24 }
  0xc3   : > { %948 = vrsqrt.f32 %v1465_v12  ;;  %v1490_v19 = vpop.eup %944  ;;  %v434_v24 = vmul.f32 0.5, %v433_v16  ;;  %v636_v8 = vperm.slane %v1467_v27, 0  ;;  %vm438_vm10 = vweird.f32 %v1446_v40 }
  0xc4   : > { %v450_v15 = vsel %vm1471_vm6, %v1368_v23, %v446_v0  ;;  %v472_v55 = vmul.f32 %v1393_v43, %v471_v9  ;;  %v489_v18 = vmul.f32 %v1457_v61, %v488_v7  ;;  %v1914_v23 = vperm.slane %v1461_v10, 0  ;;  %v1495_v26 = vpop.eup %946  ;;  %vm1543_vm12 = vmor %vm437_vm8, %vm438_vm10 }
  0xc5   : > { %950 = vrsqrt.f32 %v1483_v17  ;;  %v1498_v38 = vmul.f32 14.285714, %v450_v15  ;;  %v498_v44 = vmul.f32 %v1490_v19, %v1421_v54  ;;  %v435_v49 = vsub.f32 1.5, %v434_v24 }
  0xc6   : > { %v490_v42 = vmul.f32 0.5, %v489_v18  ;;  %v476_v48 = vsel %vm1504_vm9, %v1393_v43, %v472_v55  ;;  %v478_v52 = vmul.f32 %v1495_v26, %v1438_v63  ;;  %952 = vrsqrt.f32 %v1488_v6 }
  0xc7   : > { %v344_v21 = vpop.xlane.xlu2 %343  ;;  %v499_v35 = vmul.f32 %v1490_v19, %v498_v44  ;;  %v436_v60 = vmul.f32 %v1446_v40, %v435_v49  ;;  %vm494_vm11 = vweird.f32 %v1457_v61  ;;  %v1912_v36 = vperm.slane %v1498_v38, 0 }
  0xc8   : > { %v341_v25 = vpop.xlane.xlu1 %340  ;;  %v491_v2 = vsub.f32 1.5, %v490_v42  ;;  %v479_v43 = vmul.f32 %v1495_v26, %v478_v52  ;;  %v1525_v14 = vmax.f32 %v344_v21, 1e-24  ;;  %v1528_v62 = vmul.f32 %v643_v3, %v476_v48 }
  0xc9   : > { %v338_v45 = vpop.xlane.xlu0 %337  ;;  %v1518_v58 = vmax.f32 %v341_v25, 1e-24  ;;  %v1520_v59 = vpop.eup %948  ;;  %v1537_v0 = vmul.f32 %v1915_v20, %v1284_v32  ;;  %vm493_vm13 = vweird.f32 %v1387_v39  ;;  %v1548_v3 = vmul.f32 0.5, %v499_v35 }
  0xca   : > { %v492_v1 = vmul.f32 %v1457_v61, %v491_v2  ;;  %v1554_v11 = vmul.f32 %v1914_v23, %v1286_v33  ;;  %v645_v32 = vmul.f32 %v636_v8, %v1294_v37  ;;  %v440_v31 = vsel %vm1543_vm12, %v1446_v40, %v436_v60  ;;  %vm1564_vm14 = vmor %vm493_vm13, %vm494_vm11 }
  0xcb   : > { %954 = vrsqrt.f32 %v1518_v58  ;;  %v1532_v53 = vpop.eup %950  ;;  %v518_v30 = vmul.f32 %v1520_v59, %v1465_v12  ;;  %v1575_v37 = vmul.f32 0.5, %v479_v43  ;;  %vm533_vm15 = vweird.f32 %v1483_v17 }
  0xcc   : > { %956 = vrsqrt.f32 %v1525_v14  ;;  %v1570_v9 = vpop.eup %952  ;;  %v496_v33 = vsel %vm1564_vm14, %v1457_v61, %v492_v1  ;;  %v528_v40 = vmul.f32 %v1532_v53, %v1483_v17  ;;  %v1583_v16 = vmul.f32 %v1912_v36, %v1310_v51 }
  0xcd   : > { %v508_v61 = vmul.f32 %v1570_v9, %v1488_v6  ;;  %vm513_vm0 = vweird.f32 %v1488_v6  ;;  %v1590_v24 = vmul.f32 14.285714, %v440_v31  ;;  %v501_v25 = vsub.f32 1.5, %v1548_v3 }
  0xce   : > { %v529_v21 = vmul.f32 %v1532_v53, %v528_v40  ;;  %v1594_v41 = vmax.f32 %v338_v45, 1e-24  ;;  %v1598_v51 = vmul.f32 %v645_v32, %v496_v33  ;;  %v519_v44 = vmul.f32 %v1520_v59, %v518_v30 }
  0xcf   : > { %v353_v15 = vpop.xlane.xlu2 %352  ;;  %v509_v48 = vmul.f32 %v1570_v9, %v508_v61  ;;  %v481_v2 = vsub.f32 1.5, %v1575_v37  ;;  %vm553_vm1 = vweird.f32 %v1518_v58  ;;  %vm534_vm2 = vweird.f32 %v1532_v53 }
  0xd0   : > { %v350_v7 = vpop.xlane.xlu1 %349  ;;  %v530_v35 = vmul.f32 0.5, %v529_v21  ;;  %958 = vrsqrt.f32 %v1594_v41  ;;  %v1913_v1 = vperm.slane %v1590_v24, 0  ;;  %v1617_v31 = vmax.f32 %v353_v15, 1e-24  ;;  %vm535_vm4 = vmor %vm533_vm15, %vm534_vm2 }
  0xd1   : > { %v347_v18 = vpop.xlane.xlu0 %346  ;;  %v1596_v42 = vpop.eup %954  ;;  %v1602_v49 = vmax.f32 %v350_v7, 1e-24  ;;  %v510_v45 = vmul.f32 0.5, %v509_v48  ;;  %vm514_vm3 = vweird.f32 %v1570_v9  ;;  %v1623_v40 = vmul.f32 0.5, %v519_v44 }
  0xd2   : > { %v1604_v52 = vpop.eup %956  ;;  %v548_v60 = vmul.f32 %v1596_v42, %v1518_v58  ;;  %v531_v4 = vsub.f32 1.5, %v530_v35  ;;  %v1621_v33 = vmax.f32 %v347_v18, 1e-24  ;;  %v699_v15 = vperm.slane %v1598_v51, %v1370_v22  ;;  %vm515_vm7 = vmor %vm513_vm0, %vm514_vm3 }
  0xd3   : > { %v558_v43 = vmul.f32 %v1604_v52, %v1525_v14  ;;  %960 = vrsqrt.f32 %v1602_v49  ;;  %v511_v39 = vsub.f32 1.5, %v510_v45  ;;  %vm554_vm5 = vweird.f32 %v1596_v42 }
  0xd4   : > { %v549_v32 = vmul.f32 %v1596_v42, %v548_v60  ;;  %v532_v7 = vmul.f32 %v1532_v53, %v531_v4  ;;  %962 = vrsqrt.f32 %v1617_v31  ;;  %vm503_vm6 = vweird.f32 %v1421_v54  ;;  %vm555_vm9 = vmor %vm553_vm1, %vm554_vm5 }
  0xd5   : > { %v559_v30 = vmul.f32 %v1604_v52, %v558_v43  ;;  %v512_v18 = vmul.f32 %v1570_v9, %v511_v39  ;;  %964 = vrsqrt.f32 %v1621_v33  ;;  %vm523_vm8 = vweird.f32 %v1465_v12 }
  0xd6   : > { %v550_v61 = vmul.f32 0.5, %v549_v32  ;;  %v1636_v35 = vpop.eup %958  ;;  %v536_v60 = vsel %vm535_vm4, %v1532_v53, %v532_v7  ;;  %vm593_vm10 = vweird.f32 %v1617_v31  ;;  %vm573_vm11 = vweird.f32 %v1621_v33 }
  0xd7   : > { %v362_v48 = vpop.xlane.xlu2 %361  ;;  %v1651_v32 = vmul.f32 %v1554_v11, %v536_v60  ;;  %v516_v39 = vsel %vm515_vm7, %v1570_v9, %v512_v18  ;;  %v1654_v36 = vmul.f32 0.5, %v559_v30  ;;  %v538_v53 = vmul.f32 %v1636_v35, %v1594_v41 }
  0xd8   : > { %v359_v21 = vpop.xlane.xlu1 %358  ;;  %v551_v17 = vsub.f32 1.5, %v550_v61  ;;  %v1646_v43 = vmax.f32 %v362_v48, 1e-24  ;;  %v1659_v6 = vmul.f32 %v1451_v57, %v516_v39  ;;  %v1668_v11 = vmul.f32 %v1913_v1, %v1318_v56 }
  0xd9   : > { %v356_v44 = vpop.xlane.xlu0 %355  ;;  %v1644_v45 = vmax.f32 %v359_v21, 1e-24  ;;  %v1648_v4 = vpop.eup %960  ;;  %v521_v9 = vsub.f32 1.5, %v1623_v40  ;;  %v539_v57 = vmul.f32 %v1636_v35, %v538_v53  ;;  %v1684_v40 = vadd.s32 4294967288, %v1370_v22 }
  0xda   : > { %v552_v7 = vmul.f32 %v1596_v42, %v551_v17  ;;  %v578_v61 = vmul.f32 %v1648_v4, %v1602_v49  ;;  %v1678_v30 = vpop.eup %962  ;;  %v702_v39 = vperm.slane %v1659_v6, %v1370_v22  ;;  %vm697_vm15 = vcmask 130112  }
  0xdb   : > { %966 = vrsqrt.f32 %v1644_v45  ;;  %v1686_v48 = vpop.eup %964  ;;  %v1692_v60 = vmul.f32 0.5, %v539_v57  ;;  %v588_v17 = vmul.f32 %v1678_v30, %v1617_v31  ;;  %vm594_vm12 = vweird.f32 %v1678_v30 }
  0xdc   : > { %968 = vrsqrt.f32 %v1646_v43  ;;  %v556_v21 = vsel %vm555_vm9, %v1596_v42, %v552_v7  ;;  %v579_v56 = vmul.f32 %v1648_v4, %v578_v61  ;;  %v568_v53 = vmul.f32 %v1686_v48, %v1621_v33  ;;  %vm1754_vm7 = vmor %vm593_vm10, %vm594_vm12 }
  0xdd   : > { %v1689_v58 = vmul.f32 %v1412_v50, %v556_v21  ;;  %v1703_v50 = vmax.f32 %v356_v44, 1e-24  ;;  %v589_v21 = vmul.f32 %v1678_v30, %v588_v17  ;;  %vm574_vm13 = vweird.f32 %v1686_v48 }
  0xde   : > { %v1705_v57 = vmul.f32 0.5, %v579_v56  ;;  %v569_v23 = vmul.f32 %v1686_v48, %v568_v53  ;;  %vm613_vm14 = vweird.f32 %v1644_v45  ;;  %v502_v34 = vmul.f32 %v1490_v19, %v501_v25  ;;  %vm575_vm10 = vmor %vm573_vm11, %vm574_vm13 }
  0xdf   : > { %v268_v61 = vpop.xlane.xlu2 %267  ;;  %970 = vrsqrt.f32 %v1703_v50  ;;  %v590_v17 = vmul.f32 0.5, %v589_v21  ;;  %vm483_vm0 = vweird.f32 %v1438_v63  ;;  %vm563_vm1 = vweird.f32 %v1525_v14 }
  0xe0   : > { %v262_v7 = vpop.xlane.xlu1 %261  ;;  %v570_v53 = vmul.f32 0.5, %v569_v23  ;;  %vm504_vm2 = vweird.f32 %v1490_v19  ;;  %v522_v3 = vmul.f32 %v1520_v59, %v521_v9  ;;  %vm524_vm4 = vweird.f32 %v1520_v59 }
  0xe1   : > { %v1710_v1 = vpop.xlane.xlu0 %255  ;;  %v1712_v42 = vpop.eup %966  ;;  %v646_v21 = vmul.f32 %v636_v8, %v262_v7  ;;  %v591_v44 = vsub.f32 1.5, %v590_v17  ;;  %vm505_vm3 = vmor %vm503_vm6, %vm504_vm2  ;;  %v648_v27 = vmul.f32 %v637_v46, %v268_v61  ;;  %vm583_vm6 = vweird.f32 %v1602_v49 }
  0xe2   : > { %v1719_v56 = vpop.eup %968  ;;  %v608_v20 = vmul.f32 %v1712_v42, %v1644_v45  ;;  %v571_v25 = vsub.f32 1.5, %v570_v53  ;;  %v506_v47 = vsel %vm505_vm3, %v1490_v19, %v502_v34  ;;  %vm525_vm5 = vmor %vm523_vm8, %vm524_vm4  ;;  %vm614_vm8 = vweird.f32 %v1712_v42  ;;  %v923_v34 = vld [vmem:[%s1910_s2] ss:$0 sm:$0xff] }
  0xe3   : > { %v618_v55 = vmul.f32 %v1719_v56, %v1646_v43  ;;  %v662_v54 = vmul.f32 %v646_v21, %v506_v47  ;;  %v526_v7 = vsel %vm525_vm5, %v1520_v59, %v522_v3  ;;  %vm543_vm9 = vweird.f32 %v1594_v41  ;;  %vm615_vm11 = vmor %vm613_vm14, %vm614_vm8 }
  0xe4   : > { %v609_v18 = vmul.f32 %v1712_v42, %v608_v20  ;;  %v592_v20 = vmul.f32 %v1678_v30, %v591_v44  ;;  %v572_v28 = vmul.f32 %v1686_v48, %v571_v25  ;;  %v664_v47 = vmul.f32 %v648_v27, %v526_v7 }
  0xe5   : > { %v619_v23 = vmul.f32 %v1719_v56, %v618_v55  ;;  %v1747_v9 = vpop.eup %970  ;;  %v700_v31 = vperm.slane %v662_v54, %v1684_v40  ;;  %v581_v61 = vsub.f32 1.5, %v1705_v57  ;;  %vm623_vm12 = vweird.f32 %v1646_v43 }
  0xe6   : > { %v610_v8 = vmul.f32 0.5, %v609_v18  ;;  %v596_v19 = vsel %vm1754_vm7, %v1678_v30, %v592_v20  ;;  %v598_v55 = vmul.f32 %v1747_v9, %v1703_v50  ;;  %v576_v44 = vsel %vm575_vm10, %v1686_v48, %v572_v28 }
  0xe7   : > { %v620_v46 = vmul.f32 0.5, %v619_v23  ;;  %v286_v18 = vpop.xlane.xlu2 %285  ;;  %v703_v30 = vperm.slane %v664_v47, %v1684_v40  ;;  %v482_v33 = vmul.f32 %v1495_v26, %v481_v2  ;;  %v1779_v17 = vmul.f32 %v1668_v11, %v596_v19 }
  0xe8   : > { %v280_v12 = vpop.xlane.xlu1 %279  ;;  %v611_v59 = vsub.f32 1.5, %v610_v8  ;;  %v1782_v53 = vmul.f32 %v1537_v0, %v576_v44  ;;  %v599_v57 = vmul.f32 %v1747_v9, %v598_v55  ;;  %v701_v37 = vsel %vm697_vm15, %v700_v31, %v699_v15 }
  0xe9   : > { %v274_v3 = vpop.xlane.xlu0 %273  ;;  %v621_v48 = vsub.f32 1.5, %v620_v46  ;;  %v704_v0 = vsel %vm697_vm15, %v703_v30, %v702_v39  ;;  %vm484_vm13 = vweird.f32 %v1495_v26  ;;  %vm720_vm14 = vcmask 1041409  }
  0xea   : > { %v612_v21 = vmul.f32 %v1712_v42, %v611_v59  ;;  %v600_v11 = vmul.f32 0.5, %v599_v57  ;;  %vm485_vm2 = vmor %vm483_vm0, %vm484_vm13  ;;  %v1943_v45 = vperm.slane %v1378_v29, 0  ;;  %v711_v15 = vperm.slane %v1782_v53, %v1370_v22 }
  0xeb   : > { %v486_v6 = vsel %vm485_vm2, %v1495_v26, %v482_v33  ;;  %v1944_v39 = vsub.f32 1.5, %v1654_v36  ;;  %vm564_vm3 = vweird.f32 %v1604_v52  ;;  %vm603_vm0 = vweird.f32 %v1703_v50 }
  0xec   : > { %v616_v2 = vsel %vm615_vm11, %v1712_v42, %v612_v21  ;;  %v644_v51 = vmul.f32 %v1943_v45, %v1710_v1  ;;  %vm565_vm4 = vmor %vm563_vm1, %vm564_vm3  ;;  %v1945_v29 = vperm.slane %v1353_v13, 0  ;;  %v582_v26 = vmul.f32 %v1648_v4, %v581_v61 }
  0xed   : > { %v562_v25 = vmul.f32 %v1604_v52, %v1944_v39  ;;  %v1813_v42 = vmul.f32 %v1583_v16, %v616_v2  ;;  %vm584_vm5 = vweird.f32 %v1648_v4  ;;  %v1946_v23 = vperm.slane %v1459_v5, 0 }
  0xee   : > { %v660_v63 = vmul.f32 %v644_v51, %v486_v6  ;;  %v652_v1 = vmul.f32 %v1945_v29, %v280_v12  ;;  %v1947_v16 = vsub.f32 1.5, %v1692_v60  ;;  %v601_v8 = vsub.f32 1.5, %v600_v11  ;;  %vm585_vm1 = vmor %vm583_vm6, %vm584_vm5 }
  0xef   : > { %v566_v36 = vsel %vm565_vm4, %v1604_v52, %v562_v25  ;;  %v654_v27 = vmul.f32 %v1946_v23, %v286_v18  ;;  %vm544_vm7 = vweird.f32 %v1636_v35  ;;  %v586_v52 = vsel %vm585_vm1, %v1648_v4, %v582_v26  ;;  %v740_v47 = vpop.permute.xlu2 %739 }
  0xf0   : > { %v542_v20 = vmul.f32 %v1636_v35, %v1947_v16  ;;  %v696_v14 = vperm.slane %v660_v63, %v1684_v40  ;;  %v668_v54 = vmul.f32 %v652_v1, %v566_v36  ;;  %v298_v13 = vpop.xlane.xlu1 %297  ;;  %vm545_vm8 = vmor %vm543_vm9, %vm544_vm7  ;;  %vm722_vm10 = vcmask 1042434  }
  0xf1   : > { %v1948_v5 = vperm.slane %v1461_v10, 0  ;;  %v622_v7 = vmul.f32 %v1719_v56, %v621_v48  ;;  %v1949_v49 = vperm.slane %v1528_v62, %v1370_v22  ;;  %v670_v46 = vmul.f32 %v654_v27, %v586_v52 }
  0xf2   : > { %v709_v4 = vperm.slane %v668_v54, %v1684_v40  ;;  %v546_v41 = vsel %vm545_vm8, %v1636_v35, %v542_v20  ;;  %vm624_vm6 = vweird.f32 %v1719_v56  ;;  %v1950_v19 = vperm.slane %v1498_v38, 0  ;;  %v292_v35 = vpop.xlane.xlu0 %291 }
  0xf3   : > { %v650_v60 = vmul.f32 %v1948_v5, %v274_v3  ;;  %v698_v28 = vsel %vm697_vm15, %v696_v14, %v1949_v49  ;;  %v1951_v55 = vperm.slane %v1689_v58, %v1370_v22  ;;  %vm724_vm9 = vcmask 1043459   ;;  %vm625_vm11 = vmor %vm623_vm12, %vm624_vm6 }
  0xf4   : > { %v721_v10 = vsel %vm720_vm14, %v701_v37, %v698_v28  ;;  %v658_v59 = vmul.f32 %v1950_v19, %v298_v13  ;;  %v626_v61 = vsel %vm625_vm11, %v1719_v56, %v622_v7  ;;  %vm742_vm13 = vcmp.eq.s32.totalorder %v740_v47, %v923_v34 }
  0xf5   : > { %v666_v12 = vmul.f32 %v650_v60, %v546_v41  ;;  %v710_v62 = vsel %vm697_vm15, %v709_v4, %v1951_v55  ;;  %v723_v31 = vsel %vm722_vm10, %v704_v0, %v721_v10  ;;  %v602_v44 = vmul.f32 %v1747_v9, %v601_v8 }
  0xf6   : > { %v712_v38 = vperm.slane %v670_v46, %v1684_v40  ;;  %v674_v30 = vmul.f32 %v658_v59, %v626_v61  ;;  %v1047_v33 = vmov 0.0   ;;  %vm604_vm2 = vweird.f32 %v1747_v9 }
  0xf7   : > { %v706_v18 = vperm.slane %v666_v12, %v1684_v40  ;;  %v873_v58 = vsel %vm742_vm13, 1.0, %v1047_v33  ;;  %v1952_v53 = vperm.slane %v1651_v32, %v1370_v22  ;;  %vm605_vm12 = vmor %vm603_vm0, %vm604_vm2  ;;  %v1953_v56 = vperm.slane %v1590_v24, 0 }
  0xf8   : > { %vm677_vm14 = vcmp.eq.s32.totalorder %v1370_v22, 0  ;;  %vm746_vm3 = vcmask 130048   ;;  %v718_v3 = vperm.slane %v674_v30, %v1684_v40  ;;  %v606_v48 = vsel %vm605_vm12, %v1747_v9, %v602_v44 }
  0xf9   : > { %v707_v43 = vsel %vm697_vm15, %v706_v18, %v1952_v53  ;;  %v656_v21 = vmul.f32 %v1953_v56, %v292_v35  ;;  %v745_v32 = vsel %vm677_vm14, 0.0, %v873_v58  ;;  %vm726_vm4 = vcmask 1044484  }
  0xfa   : > { %v725_v57 = vsel %vm724_vm9, %v707_v43, %v723_v31  ;;  %v756_v0 = vsel %vm746_vm3, %v745_v32, 0.0  ;;  %v713_v50 = vsel %vm697_vm15, %v712_v38, %v711_v15  ;;  %v717_v24 = vperm.slane %v1813_v42, %v1370_v22 }
  0xfb   : > { %v672_v37 = vmul.f32 %v656_v21, %v606_v48  ;;  %757 = vadd.xlane.f32.xlu1 %v756_v0  ;;  %v727_v2 = vsel %vm726_vm4, %v710_v62, %v725_v57  ;;  %vm728_vm0 = vcmask 1045509   ;;  %v714_v11 = vperm.slane %v1779_v17, %v1370_v22 }
  0xfc   : > { %v729_v45 = vsel %vm728_vm0, %v713_v50, %v727_v2  ;;  %vm730_vm5 = vcmask 1046534   ;;  %v719_v51 = vsel %vm697_vm15, %v718_v3, %v717_v24  ;;  %vm732_vm1 = vcmask 1047559  }
  0xfd   : > { %v715_v9 = vperm.slane %v672_v37, %v1684_v40  ;;  %vm783_vm6 = vcmask 7168  }
  0xff   : > { %v716_v6 = vsel %vm697_vm15, %v715_v9, %v714_v11 }
 0x100   : > { %v731_v39 = vsel %vm730_vm5, %v716_v6, %v729_v45 }
 0x101   : > { %v733_v15 = vsel %vm732_vm1, %v719_v51, %v731_v39 }
 0x102   : > { %v735_v25 = vsel %vm677_vm14, -1e+30, %v733_v15 }
 0x103   : > { %v747_v42 = vsel %vm746_vm3, %v735_v25, -inf  ;;  %v759_v63 = vmul.f32 %v745_v32, %v735_v25 }
 0x104   : > { %748 = vmax.xlane.f32.xlu0 %v747_v42 }
 0x105   : > { %v760_v17 = vsel %vm746_vm3, %v759_v63, 0.0 }
 0x106   : > { %761 = vadd.xlane.f32.xlu1 %v760_v17 }
 0x16e   : > { %v758_v23 = vpop.xlane.xlu1 %757 }
 0x16f   : > { %vm768_vm15 = vweird.f32 %v758_v23  ;;  %v774_v8 = vand.u32 2147483648, %v758_v23  ;;  %v772_v54 = vand.u32 2147483647, %v758_v23 }
 0x171   : > { %v775_v13 = vor.u32 1.1754944e-38, %v774_v8  ;;  %vm773_vm10 = vcmp.eq.f32.partialorder %v772_v54, 8.507059e+37 }
 0x177   : > { %v749_v40 = vpop.xlane.xlu0 %748 }
 0x178   : > { %v750_v29 = vsub.f32 %v735_v25, %v749_v40 }
 0x179   : > { %v762_v7 = vpop.xlane.xlu1 %761 }
 0x17a   : > { %v751_v1 = vmul.f32 1.442695, %v750_v29 }
 0x17c   : > { %972 = vpow2.f32 %v751_v1 }
 0x17d   : > { %974 = vrcp.f32 %v758_v23 }
 0x182   : > { %v973_v26 = vpop.eup %972 }
 0x183   : > { %v753_v36 = vsel %vm746_vm3, %v973_v26, 0.0  ;;  %v975_v27 = vpop.eup %974 }
 0x184   : > { %754 = vadd.xlane.f32.xlu0 %v753_v36  ;;  %v764_v22 = vmul.f32 %v975_v27, %v758_v23  ;;  %vm769_vm7 = vweird.f32 %v975_v27 }
 0x185   : > { %vm770_vm8 = vmor %vm768_vm15, %vm769_vm7 }
 0x186   : > { %v765_v16 = vsub.f32 1.0, %v764_v22 }
 0x188   : > { %v766_v20 = vmul.f32 %v975_v27, %v765_v16 }
 0x18a   : > { %v767_v14 = vadd.f32 %v975_v27, %v766_v20 }
 0x18c   : > { %v771_v52 = vsel %vm770_vm8, %v975_v27, %v767_v14 }
 0x18d   : > { %v776_v60 = vsel %vm773_vm10, %v775_v13, %v771_v52 }
 0x18e   : > { %v777_v34 = vmul.f32 %v776_v60, %v762_v7 }
 0x190   : > { %v778_v28 = vsub.f32 %v777_v34, %v749_v40 }
 0x1f7   : > { %v755_v5 = vpop.xlane.xlu0 %754 }
 0x1f8   : > { %976 = vlog2.f32 %v755_v5 }
 0x1fe   : > { %v977_v49 = vpop.eup %976 }
 0x1ff   : > { %v780_v4 = vmul.f32 0.6931472, %v977_v49 }
 0x201   : > { %v781_v46 = vsub.f32 %v778_v28, %v780_v4 }
 0x203   : > { %v782_v41 = vsub.f32 0.0, %v781_v46 }
 0x205   : > { %784 = vst.msk [vmem:[%s209_s6] sm:$0xff] %vm783_vm6, %v782_v41 }
 0x206 PF: > { %p13_p7 = scmp.ge.s32.totalorder %s1090_s17, 4   ;;  %s1954_s12 = smov %s1034_s13 }
 0x207   : > { %s1955_s13 = smov %s1038_s14  ;;  %s1956_s14 = smov %s1100_s20 }
 0x208   : > { %s1957_s15 = smov %s1090_s17  ;;  %15 = sbr.rel (!%p13_p7) target bundleno = 3 (0x3), region = 75 }
 0x20d   :  { %804 = vsyncpa [#allocation3], 1 }
 0x20e   :  { %806 = vsyncpa [#allocation3 + $0x1], 1 }

</bundles_post_ra>
